<compile_context>
chip_gen: v6e
topology: v6e:2x2x1
jax: 0.10.0
libtpu: 0.0.40
codegen_flags: <defaults>
</compile_context>

<pallas_src>
import functools
import math

import jax
import jax.numpy as jnp
from jax.experimental import pallas as pl
from jax.experimental.pallas import tpu as pltpu

LANES = 128
SUBLANES = 8
MAX_BLOCK_ROWS = 8192                 # hard cap: (8192, 128) f32 = 4 MiB
DBUF_INPUT_BUDGET = 12 * 1024 * 1024  # double-buffered input VMEM budget


def _charbonnier_kernel(*refs, eps2, base_w, diff_alpha, shadow_alpha,
                        have_diff, have_mask, dynamic_w, block_rows,
                        tiles_per_core, rows_valid, need_mask):
    it = iter(refs)
    w_ref = next(it) if dynamic_w else None
    x_ref = next(it)
    y_ref = next(it)
    diff_ref = next(it) if have_diff else None
    mask_ref = next(it) if have_mask else None
    out_ref = next(it)
    acc_ref = next(it)

    # Zero this core's accumulator at the start of the reduction axis.
    @pl.when(pl.program_id(1) == 0)
    def _():
        acc_ref[...] = jnp.zeros_like(acc_ref)

    x = x_ref[...].astype(jnp.float32)
    y = y_ref[...].astype(jnp.float32)
    d = x - y
    sq = d * d

    # Weight: scalar diff/mask already folded into base_w (python float on the
    # static path, (1,) f32 SMEM scalar on the dynamic path).
    plain = (not dynamic_w) and (not have_diff) and (not have_mask) and (base_w == 1.0)
    w = w_ref[0] if dynamic_w else base_w
    if have_diff:
        w = w + diff_alpha * diff_ref[...].astype(jnp.float32)
    if have_mask:
        w = w + shadow_alpha * mask_ref[...].astype(jnp.float32)

    # Default path skips the multiply (no reliance on 1.0*x folding).
    val = jnp.sqrt(sq + eps2) if plain else jnp.sqrt(w * sq + eps2)

    if need_mask:
        # Rows past the logical end of the slab (partial last block / extra
        # per-core tiles) hold unspecified data: zero their contribution.
        # Uses the *unclamped* logical tile index, so clamped DMAs are safe.
        tile = pl.program_id(0) * tiles_per_core + pl.program_id(1)
        row = tile * block_rows + jax.lax.broadcasted_iota(
            jnp.int32, (block_rows, 1), 0)
        val = jnp.where(row < rows_valid, val, 0.0)

    # Fold the block's rows onto the (8, 128) accumulator: the reshape only
    # splits the sublane-major dim (layout no-op); the sum is cross-vreg VPU
    # adds.  No per-step cross-lane XLU reduction.
    acc_ref[...] += val.reshape(block_rows // SUBLANES, SUBLANES, LANES).sum(axis=0)

    # Emit this core's partial sums on the last reduction step.
    @pl.when(pl.program_id(1) == pl.num_programs(1) - 1)
    def _():
        out_ref[...] = acc_ref[...]


def _num_parallel_cores():
    """2 on parts with two TensorCores per device (v7x / v4 / v5p), else 1."""
    try:
        kind = jax.devices()[0].device_kind.lower()
    except Exception:
        return 1
    if ("v7" in kind) or ("v4" in kind) or ("v5p" in kind):
        return 2
    return 1


def _concrete_float(v):
    try:
        return float(v)
    except Exception:      # traced under jit
        return None


def _to_slab(a, shape, n_elems, rows_slab, needs_pad):
    """View `a` as a (rows_slab, 128) slab, keeping its native dtype.

    With needs_pad=False this is a pure reshape of a contiguous array (bitcast,
    zero extra HBM traffic).  Padding (one real copy) only happens for
    lane-unaligned or tiny inputs.
    """
    a = jnp.asarray(a)
    if a.shape != shape:
        # TODO(synk): stream broadcastable diff/mask compactly (modulo
        # index_map) instead of materializing the expanded array.
        a = jnp.broadcast_to(a, shape)
    if not needs_pad:
        return a.reshape(rows_slab, LANES)
    flat = a.reshape(-1)
    flat = jnp.pad(flat, (0, rows_slab * LANES - n_elems))
    return flat.reshape(rows_slab, LANES)


def charbonnier_loss(x, y, mask=0, diff=0, *, eps=1e-3,
                     m_diff_alpha=0.0, m_shadow_alpha=0.0,
                     max_block_rows=None):
    # NOTE: m_diff_alpha / m_shadow_alpha are module constructor constants and
    # must be static Python numbers; x/y/mask/diff may be traced.
    x = jnp.asarray(x)
    y = jnp.asarray(y)
    mask_a = jnp.asarray(mask)
    diff_a = jnp.asarray(diff)

    # Broadcast shape of the full expression (tensor diff/mask included, like torch).
    shapes = [x.shape, y.shape]
    if diff_a.ndim > 0:
        shapes.append(diff_a.shape)
    if mask_a.ndim > 0:
        shapes.append(mask_a.shape)
    shape = jnp.broadcast_shapes(*shapes)
    n_elems = math.prod(shape) if shape else 1

    # Which weight terms need to be streamed as full tensors?
    have_diff = (diff_a.ndim > 0) and (m_diff_alpha != 0)
    have_mask = (mask_a.ndim > 0) and (m_shadow_alpha != 0)

    # Fold scalar diff/mask into a single weight.  Concrete scalars bake into
    # the kernel; traced scalars fold into one (1,) f32 SMEM value.
    base_w = 1.0
    dynamic_w = False
    if (diff_a.ndim == 0) and (m_diff_alpha != 0):
        c = _concrete_float(diff_a)
        if c is not None:
            base_w = base_w + float(m_diff_alpha) * c
        else:
            base_w = base_w + float(m_diff_alpha) * diff_a.astype(jnp.float32)
            dynamic_w = True
    if (mask_a.ndim == 0) and (m_shadow_alpha != 0):
        c = _concrete_float(mask_a)
        if c is not None:
            base_w = base_w + float(m_shadow_alpha) * c
        else:
            base_w = base_w + float(m_shadow_alpha) * mask_a.astype(jnp.float32)
            dynamic_w = True

    streams = [x, y]
    if have_diff:
        streams.append(diff_a)
    if have_mask:
        streams.append(mask_a)

    # Row alignment = packed sublane tile of the narrowest streamed dtype
    # (8 for f32, 16 for bf16, 32 for int8/fp8).
    min_itemsize = min(s.dtype.itemsize for s in streams)
    row_align = max(32 // min_itemsize, SUBLANES)

    rows_needed = -(-n_elems // LANES)
    needs_pad = (n_elems % LANES != 0) or (rows_needed < row_align)
    if needs_pad:
        rows_slab = -(-max(rows_needed, row_align) // row_align) * row_align
    else:
        rows_slab = rows_needed
    n_slab = rows_slab * LANES

    # Stream-count-aware block size: largest block keeping double-buffered
    # inputs within DBUF_INPUT_BUDGET (headroom for f32 temporaries under the
    # 32 MiB scoped-VMEM limit), capped and rounded to the packed sublane tile.
    sum_itemsize = sum(s.dtype.itemsize for s in streams)
    target = DBUF_INPUT_BUDGET // (2 * LANES * sum_itemsize)
    if max_block_rows is not None:
        target = min(target, max_block_rows)
    target = min(target, MAX_BLOCK_ROWS)
    target = max((target // row_align) * row_align, row_align)
    block_rows = min(target, (rows_slab // row_align) * row_align)

    num_tiles = -(-rows_slab // block_rows)
    ncores = min(_num_parallel_cores(), num_tiles)
    tiles_per_core = -(-num_tiles // ncores)
    need_mask = (ncores * tiles_per_core * block_rows) != rows_slab

    slabs = [_to_slab(s, shape, n_elems, rows_slab, needs_pad) for s in streams]

    kernel = functools.partial(
        _charbonnier_kernel,
        eps2=float(eps) * float(eps),
        base_w=(1.0 if dynamic_w else float(base_w)),
        diff_alpha=float(m_diff_alpha),
        shadow_alpha=float(m_shadow_alpha),
        have_diff=have_diff,
        have_mask=have_mask,
        dynamic_w=dynamic_w,
        block_rows=block_rows,
        tiles_per_core=tiles_per_core,
        rows_valid=rows_slab,
        need_mask=need_mask,
    )

    stream_spec = pl.BlockSpec(
        (block_rows, LANES),
        # Clamp so a fully out-of-range per-core tile never starts a DMA past
        # the slab; the in-kernel row mask (computed from the unclamped ids)
        # zeroes any duplicated contribution.
        lambda c, i: (jnp.minimum(c * tiles_per_core + i, num_tiles - 1), 0),
    )

    in_specs = []
    operands = []
    if dynamic_w:
        in_specs.append(pl.BlockSpec(memory_space=pltpu.MemorySpace.SMEM))
        operands.append(jnp.asarray(base_w, jnp.float32).reshape(1))
    in_specs += [stream_spec] * len(slabs)
    operands += slabs

    partials = pl.pallas_call(
        kernel,
        out_shape=jax.ShapeDtypeStruct((ncores * SUBLANES, LANES), jnp.float32),
        grid_spec=pltpu.PrefetchScalarGridSpec(
            num_scalar_prefetch=0,
            grid=(ncores, tiles_per_core),
            in_specs=in_specs,
            out_specs=pl.BlockSpec((SUBLANES, LANES), lambda c, i: (c, 0)),
            scratch_shapes=[pltpu.VMEM((SUBLANES, LANES), jnp.float32)],
        ),
        compiler_params=pltpu.CompilerParams(
            dimension_semantics=("parallel", "arbitrary"),
            vmem_limit_bytes=32 * 1024 * 1024,
        ),
    )(*operands)

    total = jnp.sum(partials)

    # Zero-padded tail elements (pad path only) each contributed sqrt(eps^2).
    n_pad = n_slab - n_elems
    if n_pad:
        total = total - jnp.float32(n_pad) * jnp.sqrt(
            jnp.float32(float(eps) * float(eps)))

    # TODO(synk): `color_space` is unused in the reference forward and
    # `.cuda()` / `torch.ones` device placement has no Pallas analogue.
    return total / jnp.float32(n_elems)


if __name__ == "__main__":
    key = jax.random.PRNGKey(0)
    kx, ky, km, kd = jax.random.split(key, 4)

    eps = 1e-3

    # NCHW example shapes, consistent with an image-restoration loss.
    x = jax.random.normal(kx, (2, 4, 16, 16), dtype=jnp.float32)
    y = jax.random.normal(ky, (2, 4, 16, 16), dtype=jnp.float32)

    # Case 1: defaults (mask=0, diff=0, alphas=0) -> plain Charbonnier; only
    # x and y are streamed, zero-copy slab views.
    out = jax.block_until_ready(charbonnier_loss(x, y, eps=eps))
    ref = jnp.mean(jnp.sqrt((x - y) ** 2 + eps * eps))
    assert jnp.allclose(out, ref, rtol=1e-5, atol=1e-6), (out, ref)

    # Case 2: tensor mask/diff with nonzero alphas (4 streams).
    mask = jax.random.uniform(km, (2, 4, 16, 16), dtype=jnp.float32)
    diff = jax.random.uniform(kd, (2, 4, 16, 16), dtype=jnp.float32)
    a_d, a_s = 0.5, 0.25
    out2 = jax.block_until_ready(
        charbonnier_loss(x, y, mask=mask, diff=diff, eps=eps,
                         m_diff_alpha=a_d, m_shadow_alpha=a_s))
    ref2 = jnp.mean(jnp.sqrt((1.0 + a_d * diff + a_s * mask) * (x - y) ** 2
                             + eps * eps))
    assert jnp.allclose(out2, ref2, rtol=1e-5, atol=1e-6), (out2, ref2)

    # Case 3: ragged size (not a multiple of 128) exercises the minimal-pad +
    # eps-correction tail handling.
    k3x, k3y = jax.random.split(kx)
    x3 = jax.random.normal(k3x, (2, 3, 15, 17), dtype=jnp.float32)
    y3 = jax.random.normal(k3y, (2, 3, 15, 17), dtype=jnp.float32)
    out3 = jax.block_until_ready(charbonnier_loss(x3, y3, eps=eps))
    ref3 = jnp.mean(jnp.sqrt((x3 - y3) ** 2 + eps * eps))
    assert jnp.allclose(out3, ref3, rtol=1e-5, atol=1e-6), (out3, ref3)

    # Case 4: lane-aligned but rows not a multiple of the block -> exercises
    # the in-kernel partial-block row mask (block capped small for the test).
    k4x, k4y = jax.random.split(ky)
    x4 = jax.random.normal(k4x, (2, 4, 16, 20), dtype=jnp.float32)
    y4 = jax.random.normal(k4y, (2, 4, 16, 20), dtype=jnp.float32)
    out4 = jax.block_until_ready(charbonnier_loss(x4, y4, eps=eps,
                                                  max_block_rows=8))
    ref4 = jnp.mean(jnp.sqrt((x4 - y4) ** 2 + eps * eps))
    assert jnp.allclose(out4, ref4, rtol=1e-5, atol=1e-6), (out4, ref4)

    # Case 5: jitted call with a traced scalar `diff` (dynamic-weight SMEM path).
    loss_jit = jax.jit(functools.partial(charbonnier_loss, eps=eps,
                                         m_diff_alpha=0.7, m_shadow_alpha=0.0))
    dval = jnp.float32(0.3)
    out5 = jax.block_until_ready(loss_jit(x, y, 0, dval))
    ref5 = jnp.mean(jnp.sqrt((1.0 + 0.7 * dval) * (x - y) ** 2 + eps * eps))
    assert jnp.allclose(out5, ref5, rtol=1e-5, atol=1e-6), (out5, ref5)

    # Case 6: bf16 inputs stream natively (16-row packed-tile alignment).
    xb = x.astype(jnp.bfloat16)
    yb = y.astype(jnp.bfloat16)
    out6 = jax.block_until_ready(charbonnier_loss(xb, yb, eps=eps))
    ref6 = jnp.mean(jnp.sqrt((xb.astype(jnp.float32) - yb.astype(jnp.float32)) ** 2
                             + eps * eps))
    assert jnp.allclose(out6, ref6, rtol=1e-5, atol=1e-6), (out6, ref6)

    print("KERNEL_OK")
</pallas_src>

<mosaic_0001>
module attributes {stable_mosaic.version = 11 : i64} {
  func.func @_charbonnier_kernel(%arg0: i32, %arg1: i32, %arg2: memref<16x128xf32, #tpu.memory_space<vmem>>, %arg3: memref<16x128xf32, #tpu.memory_space<vmem>>, %arg4: memref<8x128xf32, #tpu.memory_space<vmem>>, %arg5: memref<8x128xf32, #tpu.memory_space<vmem>>) attributes {dimension_semantics = [#tpu.dimension_semantics<parallel>, #tpu.dimension_semantics<arbitrary>], iteration_bounds = array<i64: 1, 1>, scalar_prefetch = 0 : i64, scratch_operands = 1 : i64, tpu.core_type = #tpu.core_type<tc>, window_params = [{transform_indices = @transform_0, window_bounds = array<i64: 16, 128>}, {transform_indices = @transform_1, window_bounds = array<i64: 16, 128>}, {transform_indices = @transform_2, window_bounds = array<i64: 8, 128>}]} {
    %c0_i32 = arith.constant 0 : i32
    %0 = arith.cmpi eq, %arg1, %c0_i32 : i32
    %1 = arith.extui %0 : i1 to i32
    %c0_i32_0 = arith.constant 0 : i32
    %2 = arith.cmpi ne, %1, %c0_i32_0 : i32
    scf.if %2 {
      %cst_11 = arith.constant 0.000000e+00 : f32
      %18 = vector.broadcast %cst_11 : f32 to vector<8x128xf32>
      %c0_12 = arith.constant 0 : index
      %c0_13 = arith.constant 0 : index
      %19 = vector.load %arg5[%c0_12, %c0_13] : memref<8x128xf32, #tpu.memory_space<vmem>>, vector<8x128xf32>
      tpu.vector_store %arg5[%c0_12, %c0_13], %18 {strides = array<i32>} : memref<8x128xf32, #tpu.memory_space<vmem>>, vector<8x128xf32>,
    } else {
    }
    %c0 = arith.constant 0 : index
    %c0_1 = arith.constant 0 : index
    %3 = vector.load %arg2[%c0, %c0_1] : memref<16x128xf32, #tpu.memory_space<vmem>>, vector<16x128xf32>
    %c0_2 = arith.constant 0 : index
    %c0_3 = arith.constant 0 : index
    %4 = vector.load %arg3[%c0_2, %c0_3] : memref<16x128xf32, #tpu.memory_space<vmem>>, vector<16x128xf32>
    %5 = arith.subf %3, %4 : vector<16x128xf32>
    %6 = arith.mulf %5, %5 : vector<16x128xf32>
    %cst = arith.constant 9.99999997E-7 : f32
    %7 = vector.broadcast %cst : f32 to vector<16x128xf32>
    %8 = arith.addf %6, %7 : vector<16x128xf32>
    %9 = math.sqrt %8 : vector<16x128xf32>
    %c0_4 = arith.constant 0 : index
    %c0_5 = arith.constant 0 : index
    %10 = vector.load %arg5[%c0_4, %c0_5] : memref<8x128xf32, #tpu.memory_space<vmem>>, vector<8x128xf32>
    %11 = vector.shape_cast %9 : vector<16x128xf32> to vector<2x8x128xf32>
    %cst_6 = arith.constant dense<0.000000e+00> : vector<8x128xf32>
    %12 = vector.multi_reduction <add>, %11, %cst_6 [0] : vector<2x8x128xf32> to vector<8x128xf32>
    %13 = arith.addf %10, %12 : vector<8x128xf32>
    %c0_7 = arith.constant 0 : index
    %c0_8 = arith.constant 0 : index
    %14 = vector.load %arg5[%c0_7, %c0_8] : memref<8x128xf32, #tpu.memory_space<vmem>>, vector<8x128xf32>
    tpu.vector_store %arg5[%c0_7, %c0_8], %13 {strides = array<i32>} : memref<8x128xf32, #tpu.memory_space<vmem>>, vector<8x128xf32>,
    %c0_i32_9 = arith.constant 0 : i32
    %15 = arith.cmpi eq, %arg1, %c0_i32_9 : i32
    %16 = arith.extui %15 : i1 to i32
    %c0_i32_10 = arith.constant 0 : i32
    %17 = arith.cmpi ne, %16, %c0_i32_10 : i32
    scf.if %17 {
      %c0_11 = arith.constant 0 : index
      %c0_12 = arith.constant 0 : index
      %18 = vector.load %arg5[%c0_11, %c0_12] : memref<8x128xf32, #tpu.memory_space<vmem>>, vector<8x128xf32>
      %c0_13 = arith.constant 0 : index
      %c0_14 = arith.constant 0 : index
      %19 = vector.load %arg4[%c0_13, %c0_14] : memref<8x128xf32, #tpu.memory_space<vmem>>, vector<8x128xf32>
      tpu.vector_store %arg4[%c0_13, %c0_14], %18 {strides = array<i32>} : memref<8x128xf32, #tpu.memory_space<vmem>>, vector<8x128xf32>,
    } else {
    }
    return
  }
  func.func @transform_0(%arg0: i32, %arg1: i32) -> (i32, i32) {
    %c1_i32 = arith.constant 1 : i32
    %0 = arith.muli %arg0, %c1_i32 : i32
    %1 = arith.addi %0, %arg1 : i32
    %c0_i32 = arith.constant 0 : i32
    %2 = arith.minsi %1, %c0_i32 : i32
    %c0_i32_0 = arith.constant 0 : i32
    %c0_i32_1 = arith.constant 0 : i32
    return %2, %c0_i32_0 : i32, i32
  }
  func.func @transform_1(%arg0: i32, %arg1: i32) -> (i32, i32) {
    %c1_i32 = arith.constant 1 : i32
    %0 = arith.muli %arg0, %c1_i32 : i32
    %1 = arith.addi %0, %arg1 : i32
    %c0_i32 = arith.constant 0 : i32
    %2 = arith.minsi %1, %c0_i32 : i32
    %c0_i32_0 = arith.constant 0 : i32
    %c0_i32_1 = arith.constant 0 : i32
    return %2, %c0_i32_0 : i32, i32
  }
  func.func @transform_2(%arg0: i32, %arg1: i32) -> (i32, i32) {
    %c0_i32 = arith.constant 0 : i32
    %c0_i32_0 = arith.constant 0 : i32
    return %arg0, %c0_i32 : i32, i32
  }
}

</mosaic_0001>

<bundles_post_ra>
// kernel: tpu_custom_call.1
= control target key start
LH: loop header
LB: loop body
LE: loop exit
PB: predicated region body
PF: predicated region fallthrough
CT: control target
= control target key end

     0   :  { %7 = vsyncpa [#allocation4], 0  ;;  %s222_s0 = inlined_call_operand.hbm [shape: f32[16,128], index: 0, kind: input, shape index: {}]   ;;  %s223_s1 = inlined_call_operand.hbm [shape: f32[16,128], index: 1, kind: input, shape index: {}]   ;;  %s224_s2 = inlined_call_operand.hbm [shape: f32[8,128], index: 2, kind: output, shape index: {}]  }
   0x1   :  { %8 = vsyncpa [#allocation7], 0 }
   0x2   :  { %9 = vsyncpa [#allocation5], 0  ;;  %s193_s9 = smov [#allocation3]  }
   0x3   :  { %s21_s10 = sshll.u32 %s193_s9, 4  ;;  %s22_s10 = int_to_ptr.vmem [resolvable:$true] %s21_s10 }
   0x4   :  { %s135_s11 = scalar_lea.vmem %s22_s10, 256  ;;  %p140_p1 = scmp.lt.s32.totalorder %s22_s10, %s22_s10 }
   0x5   :  { %p136_p0 = scmp.ne.s32.totalorder %s22_s10, %s135_s11  ;;  %p141_p2 = scmp.lt.s32.totalorder %s135_s11, %s135_s11 }
   0x7   :  { %p142_p3 = por %p141_p2, %p140_p1 }
   0x9   :  { %p143_p4 = pnand %p142_p3, %p136_p0 }
   0xb   :  { %146 = shalt.err (!%p143_p4)
}
   0xc   :  { %s194_s12 = smov 128   ;;  %s195_s13 = smov 8  }
   0xd   :  { %27 = dma.hbm_to_vmem [thread:$0]  %s222_s0, 256, %s22_s10, [#allocation4], %s194_s12, %s194_s12, %s195_s13  }
   0xe   :  { %s196_s16 = smov [#allocation6]  }
   0xf   :  { %s39_s17 = sshll.u32 %s196_s16, 4  ;;  %s40_s17 = int_to_ptr.vmem [resolvable:$true] %s39_s17 }
  0x10   :  { %s155_s18 = scalar_lea.vmem %s40_s17, 256  ;;  %p160_p6 = scmp.lt.s32.totalorder %s40_s17, %s40_s17 }
  0x11   :  { %p156_p5 = scmp.ne.s32.totalorder %s40_s17, %s155_s18  ;;  %p161_p7 = scmp.lt.s32.totalorder %s155_s18, %s155_s18 }
  0x13   :  { %p162_p8 = por %p161_p7, %p160_p6 }
  0x15   :  { %p163_p9 = pnand %p162_p8, %p156_p5 }
  0x17   :  { %166 = shalt.err (!%p163_p9)
}
  0x18   :  { %45 = dma.hbm_to_vmem [thread:$0]  %s223_s1, 256, %s40_s17, [#allocation7], %s194_s12, %s194_s12, %s195_s13  }
  0x19   :  { %187 = dma.done.wait [#allocation4], 256  }
  0x1a   :  { %188 = vsyncadd [#allocation4], 4294967040 }
  0x1b   :  { %189 = dma.done.wait [#allocation7], 256  }
  0x1c   :  { %190 = vsyncadd [#allocation7], 4294967040  ;;  %v65_v0 = vld [vmem:[#allocation3] sm:$0xff]  ;;  %v66_v1 = vld [vmem:[#allocation3 + $0x8] sm:$0xff]  ;;  %s197_s0 = smov [#allocation8]  }
  0x1d   :  { %v67_v2 = vld [vmem:[#allocation6] sm:$0xff]  ;;  %v68_v3 = vld [vmem:[#allocation6 + $0x8] sm:$0xff]  ;;  %s104_s1 = sshll.u32 %s197_s0, 4  ;;  %s105_s1 = int_to_ptr.vmem [resolvable:$true] %s104_s1 }
  0x1e   :  { %v69_v4 = vsub.f32 %v65_v0, %v67_v2  ;;  %v70_v5 = vsub.f32 %v66_v1, %v68_v3  ;;  %s167_s21 = scalar_lea.vmem %s105_s1, 128  ;;  %p172_p11 = scmp.lt.s32.totalorder %s105_s1, %s105_s1 }
  0x1f   :  { %p168_p10 = scmp.ne.s32.totalorder %s105_s1, %s167_s21  ;;  %p173_p12 = scmp.lt.s32.totalorder %s167_s21, %s167_s21 }
  0x20   :  { %v71_v6 = vmul.f32 %v69_v4, %v69_v4  ;;  %v72_v7 = vmul.f32 %v70_v5, %v70_v5 }
  0x21   :  { %p174_p13 = por %p173_p12, %p172_p11 }
  0x22   :  { %v73_v8 = vadd.f32 1e-06, %v71_v6  ;;  %v74_v9 = vadd.f32 1e-06, %v72_v7 }
  0x23   :  { %p175_p0 = pnand %p174_p13, %p168_p10 }
  0x24   :  { %123 = vrsqrt.f32 %v73_v8  ;;  %vm77_vm0 = vcmp.eq.f32.partialorder %v73_v8, inf  ;;  %v80_v11 = vand.u32 2147483648, %v73_v8  ;;  %vm79_vm1 = vcmp.eq.f32.partialorder %v73_v8, 0.0 }
  0x25   :  { %125 = vrsqrt.f32 %v74_v9  ;;  %vm84_vm2 = vcmp.eq.f32.partialorder %v74_v9, inf  ;;  %v87_v14 = vand.u32 2147483648, %v74_v9  ;;  %vm86_vm3 = vcmp.eq.f32.partialorder %v74_v9, 0.0 }
  0x31   :  { %v124_v10 = vpop.eup %123 }
  0x32   :  { %v126_v12 = vpop.eup %125  ;;  %v76_v13 = vmul.f32 %v124_v10, %v73_v8 }
  0x33   :  { %v83_v15 = vmul.f32 %v126_v12, %v74_v9 }
  0x34   :  { %v78_v16 = vsel %vm77_vm0, %v73_v8, %v76_v13 }
  0x35   :  { %v81_v17 = vsel %vm79_vm1, %v80_v11, %v78_v16  ;;  %v85_v18 = vsel %vm84_vm2, %v74_v9, %v83_v15 }
  0x36   :  { %v88_v19 = vsel %vm86_vm3, %v87_v14, %v85_v18 }
  0x37   :  { %v90_v20 = vadd.f32 %v88_v19, %v81_v17 }
  0x39   :  { %97 = vst [vmem:[#allocation8] sm:$0xff] %v90_v20 }
  0x3a   :  { %178 = shalt.err (!%p175_p0)
}
  0x3b   :  { %107 = dma.vmem_to_hbm [thread:$0]  %s105_s1, 128, %s224_s2, [#allocation5]  }
  0x3c   :  { %191 = dma.done.wait [#allocation5], 128  }
  0x3d   :  { %192 = vsyncadd [#allocation5], 4294967168 }
  0x3e   :  { %111 = vsyncpa [#allocation4], 1 }
  0x3f   :  { %112 = vsyncpa [#allocation7], 1 }
  0x40   :  { %113 = vsyncpa [#allocation5], 1 }

</bundles_post_ra>
